<compile_context>
chip_gen: v6e
topology: v6e:2x2x1
jax: 0.10.0
libtpu: 0.0.40
codegen_flags: <defaults>
</compile_context>

<pallas_src>
import functools
import math

import jax
import jax.numpy as jnp
from jax.experimental import pallas as pl
from jax.experimental.pallas import tpu as pltpu


# ----------------------------------------------------------------------------
# Helpers
# ----------------------------------------------------------------------------
def _nearest_src_idx(in_size: int, out_size: int):
    """PyTorch 'nearest' source indices, exact integer math: src = dst*in // out."""
    dst = jnp.arange(out_size, dtype=jnp.int32)
    src = (dst * jnp.int32(in_size)) // jnp.int32(out_size)
    return jnp.clip(src, 0, in_size - 1)


def _nearest_onehot(in_size: int, out_size: int, dtype):
    """One-hot selection matrix (in_size, out_size) for PyTorch 'nearest'."""
    src = _nearest_src_idx(in_size, out_size)
    return (jnp.arange(in_size)[:, None] == src[None, :]).astype(dtype)


def _sublane(dtype) -> int:
    """Sublane granularity for a dtype: 8 (f32) / 16 (bf16) / 32 (int8/fp8)."""
    return max(8, 32 // jnp.dtype(dtype).itemsize)


def _pad_tile_bytes(rows: int, cols: int, dtype) -> int:
    """VMEM footprint of a (rows, cols) slab after dtype-aware tile padding."""
    g = _sublane(dtype)
    itemsize = jnp.dtype(dtype).itemsize
    return (-(-rows // g) * g) * (-(-cols // 128) * 128) * itemsize


def _vmem_budget():
    """(per-step tile budget, vmem_limit_bytes) sized from the chip's VMEM."""
    cap = 64 * 1024 * 1024  # conservative default (v7x per-TC VMEM)
    try:
        info_cap = pltpu.get_tpu_info().vmem_capacity_bytes
        if info_cap:
            cap = int(info_cap)
    except Exception:
        pass
    budget = max(8 * 1024 * 1024, int(cap * 0.40))
    limit = min(int(cap * 0.75), 128 * 1024 * 1024)
    return budget, limit


def _pick_tiles_intscale(C, H, W, W_out, s, dtype, budget):
    """Largest (Ct, Th) whose double-buffered in/out blocks + selection matrix
    + matmul intermediate fit the per-step VMEM budget."""
    g = _sublane(dtype)
    K = s * W_out
    h_opts = [d for d in range(H, 0, -1) if H % d == 0 and (d == H or d % g == 0)]
    c_opts = [d for d in range(C, 0, -1) if C % d == 0]
    sel_bytes = 2 * _pad_tile_bytes(W, W_out, dtype)
    best = None
    for th in h_opts:
        for ct in c_opts:
            need = (2 * ct * _pad_tile_bytes(th, W, dtype)       # input (dbl-buf)
                    + 2 * ct * _pad_tile_bytes(th, K, dtype)     # output (dbl-buf)
                    + ct * _pad_tile_bytes(th, W_out, dtype)     # matmul result
                    + sel_bytes)
            if need <= budget and (best is None or ct * th > best[0]):
                best = (ct * th, ct, th)
    if best is None:
        return c_opts[-1], h_opts[-1]
    return best[1], best[2]


def _ensure_parallel_steps(N, C, H, Ct, Th, g, min_steps=2):
    """Keep >= min_steps grid points along 'parallel' axes (megacore on v7x)."""
    if N * (C // Ct) * (H // Th) >= min_steps:
        return Ct, Th
    # Prefer splitting C (keeps lane density), then H.
    for ct in range(Ct - 1, 0, -1):
        if C % ct == 0 and N * (C // ct) * (H // Th) >= min_steps:
            return ct, Th
    for th in range(Th - 1, 0, -1):
        if H % th == 0 and (th == H or th % g == 0) \
                and N * (C // Ct) * (H // th) >= min_steps:
            return Ct, th
    return Ct, Th


def _pick_tiles_general(C, H, W, H_out, W_out, dtype, budget):
    """(Ct, Tho) for the general fallback: tile channels and output rows."""
    g = _sublane(dtype)
    ho_opts = [d for d in range(H_out, 0, -1)
               if H_out % d == 0 and (d == H_out or d % g == 0)]
    c_opts = [d for d in range(C, 0, -1) if C % d == 0]
    sel_bytes = 2 * _pad_tile_bytes(W, W_out, dtype)
    best = None
    for tho in ho_opts:
        sh_bytes = 2 * _pad_tile_bytes(tho, H, dtype)
        for ct in c_opts:
            need = (2 * ct * _pad_tile_bytes(H, W, dtype)        # input (full H)
                    + 2 * ct * _pad_tile_bytes(tho, W_out, dtype)  # output
                    + ct * _pad_tile_bytes(H, W_out, dtype)        # intermediate t
                    + sh_bytes + sel_bytes)
            if need <= budget and (best is None or ct * tho > best[0]):
                best = (ct * tho, ct, tho)
    if best is None:
        # Smallest legal tile; vmem_limit_bytes still has headroom above budget.
        return 1, ho_opts[-1]
    return best[1], best[2]


# ----------------------------------------------------------------------------
# Fast path: integer upscale factor (H_out = s * H)  — the module's actual use
# ----------------------------------------------------------------------------
def _interp_kernel_intscale(x_ref, sw_ref, o_ref, *, s, w_out):
    # x_ref : (1, Ct, Th, W)
    # sw_ref: (W, W_out)              one-hot W-selection matrix
    # o_ref : (1, Ct, Th, s*W_out)    contiguous view of (N, C, H_out, W_out)
    # One MXU matmul (c stays a free dim — no reshape / relayout), result in
    # the output dtype (exact: every output element is 1.0 * x).
    y = jnp.einsum("chw,wk->chk", x_ref[0], sw_ref[...],
                   preferred_element_type=o_ref.dtype)
    # H duplication = store the same row block into the s lane chunks.
    for r in range(s):
        o_ref[0, :, :, r * w_out:(r + 1) * w_out] = y


def _interp_intscale(x, H_out: int, W_out: int):
    N, C, H, W = x.shape
    s = H_out // H                      # integer row-duplication factor
    dtype = x.dtype
    itemsize = jnp.dtype(dtype).itemsize
    K = s * W_out                       # lane width of the stored output block

    sw = _nearest_onehot(W, W_out, dtype)            # (W, W_out)

    budget, vmem_limit = _vmem_budget()
    Ct, Th = _pick_tiles_intscale(C, H, W, W_out, s, dtype, budget)
    Ct, Th = _ensure_parallel_steps(N, C, H, Ct, Th, _sublane(dtype))

    cost = pl.CostEstimate(
        flops=2 * N * C * H * W * W_out,
        transcendentals=0,
        bytes_accessed=(N * C * H * W + N * C * H_out * W_out + W * W_out) * itemsize,
    )

    kernel = functools.partial(_interp_kernel_intscale, s=s, w_out=W_out)

    out_flat = pl.pallas_call(
        kernel,
        out_shape=jax.ShapeDtypeStruct((N, C, H, K), dtype),
        grid_spec=pltpu.PrefetchScalarGridSpec(
            num_scalar_prefetch=0,
            grid=(N, C // Ct, H // Th),
            in_specs=[
                pl.BlockSpec((1, Ct, Th, W), lambda n, c, h: (n, c, h, 0)),
                pl.BlockSpec((W, W_out), lambda n, c, h: (0, 0)),
            ],
            out_specs=pl.BlockSpec((1, Ct, Th, K), lambda n, c, h: (n, c, h, 0)),
        ),
        compiler_params=pltpu.CompilerParams(
            dimension_semantics=("parallel", "parallel", "parallel"),
            vmem_limit_bytes=vmem_limit,
        ),
        cost_estimate=cost,
    )(x, sw)

    # Pure-metadata reshape: (N, C, H, s*W_out) and (N, C, H*s, W_out) share
    # the same contiguous layout.
    return out_flat.reshape(N, C, H_out, W_out)


# ----------------------------------------------------------------------------
# General fallback: arbitrary (non-integer / downscale) factors
# ----------------------------------------------------------------------------
def _interp_kernel_general(x_ref, sht_ref, sw_ref, o_ref):
    # x_ref : (1, Ct, H, W)    sht_ref: (Tho, H)    sw_ref: (W, W_out)
    # o_ref : (1, Ct, Tho, W_out)
    t = jnp.einsum("chw,wk->chk", x_ref[0], sw_ref[...],
                   preferred_element_type=o_ref.dtype)
    out = jnp.einsum("mh,chk->cmk", sht_ref[...], t,
                     preferred_element_type=o_ref.dtype)
    o_ref[0] = out.astype(o_ref.dtype)


def _interp_general(x, H_out: int, W_out: int):
    N, C, H, W = x.shape
    dtype = x.dtype
    itemsize = jnp.dtype(dtype).itemsize

    # Row-selection transposed: sht[m, h] = 1 iff src_h[m] == h  → sublane-tileable.
    src_h = _nearest_src_idx(H, H_out)
    sht = (src_h[:, None] == jnp.arange(H)[None, :]).astype(dtype)   # (H_out, H)
    sw = _nearest_onehot(W, W_out, dtype)                            # (W, W_out)

    budget, vmem_limit = _vmem_budget()
    Ct, Tho = _pick_tiles_general(C, H, W, H_out, W_out, dtype, budget)

    # TODO(synk): for downscale W_out < 128 the output stores are lane-masked;
    # packing the lane dim to a multiple of 128 would avoid the partial-store
    # penalty, but this path is rarely exercised by the Transformer.

    cost = pl.CostEstimate(
        flops=2 * N * C * (H * W * W_out + H * H_out * W_out),
        transcendentals=0,
        bytes_accessed=(N * C * H * W + N * C * H_out * W_out
                        + H * H_out + W * W_out) * itemsize,
    )

    return pl.pallas_call(
        _interp_kernel_general,
        out_shape=jax.ShapeDtypeStruct((N, C, H_out, W_out), dtype),
        grid_spec=pltpu.PrefetchScalarGridSpec(
            num_scalar_prefetch=0,
            grid=(N, C // Ct, H_out // Tho),
            in_specs=[
                pl.BlockSpec((1, Ct, H, W), lambda n, c, ho: (n, c, 0, 0)),
                pl.BlockSpec((Tho, H), lambda n, c, ho: (ho, 0)),
                pl.BlockSpec((W, W_out), lambda n, c, ho: (0, 0)),
            ],
            out_specs=pl.BlockSpec((1, Ct, Tho, W_out), lambda n, c, ho: (n, c, ho, 0)),
        ),
        compiler_params=pltpu.CompilerParams(
            dimension_semantics=("parallel", "parallel", "parallel"),
            vmem_limit_bytes=vmem_limit,
        ),
        cost_estimate=cost,
    )(x, sht, sw)


# ----------------------------------------------------------------------------
# Public wrapper (== Interpolate(scale_factor, mode='nearest').forward)
# ----------------------------------------------------------------------------
def interpolate_nearest(x, scale_factor: float):
    """x: (N, C, H, W); returns (N, C, floor(H*s), floor(W*s)), PyTorch 'nearest'."""
    N, C, H, W = x.shape
    H_out = int(math.floor(H * scale_factor))
    W_out = int(math.floor(W * scale_factor))
    if H_out >= H and H_out % H == 0:
        return _interp_intscale(x, H_out, W_out)
    return _interp_general(x, H_out, W_out)


def _reference_nearest(x, scale_factor: float):
    """Pure-JAX reference matching PyTorch's 'nearest' interpolate."""
    N, C, H, W = x.shape
    H_out = int(math.floor(H * scale_factor))
    W_out = int(math.floor(W * scale_factor))
    src_h = _nearest_src_idx(H, H_out)
    src_w = _nearest_src_idx(W, W_out)
    return x[:, :, src_h[:, None], src_w[None, :]]


if __name__ == "__main__":
    key = jax.random.PRNGKey(0)
    x = jax.random.normal(key, (2, 4, 16, 16), dtype=jnp.float32)

    # Module usage: Interpolate(scale_factor=2.0, mode='nearest') in the decoder.
    out = jax.block_until_ready(interpolate_nearest(x, 2.0))
    ref = _reference_nearest(x, 2.0)
    assert out.shape == ref.shape, (out.shape, ref.shape)
    assert jnp.allclose(out, ref, atol=1e-6, rtol=1e-6), "mismatch vs reference (2.0)"

    # bf16 exercises the low-precision (exact one-hot) path.
    xb = x.astype(jnp.bfloat16)
    ob = jax.block_until_ready(interpolate_nearest(xb, 2.0))
    rb = _reference_nearest(xb, 2.0)
    assert ob.shape == rb.shape
    assert jnp.array_equal(ob, rb), "mismatch vs reference (2.0, bf16)"

    # Non-integer / downscale factors exercise the general fallback path.
    for sf in (1.5, 0.7):
        o = jax.block_until_ready(interpolate_nearest(x, sf))
        r = _reference_nearest(x, sf)
        assert o.shape == r.shape, (sf, o.shape, r.shape)
        assert jnp.allclose(o, r, atol=1e-6, rtol=1e-6), f"mismatch vs reference ({sf})"

    print("KERNEL_OK")
</pallas_src>

<mosaic_0001>
module attributes {stable_mosaic.version = 11 : i64} {
  func.func @_interp_kernel_intscale(%arg0: i32, %arg1: i32, %arg2: i32, %arg3: memref<1x4x16x16xf32, #tpu.memory_space<vmem>>, %arg4: memref<16x32xf32, #tpu.memory_space<vmem>>, %arg5: memref<1x4x16x64xf32, #tpu.memory_space<vmem>>) attributes {dimension_semantics = [#tpu.dimension_semantics<parallel>, #tpu.dimension_semantics<parallel>, #tpu.dimension_semantics<parallel>], iteration_bounds = array<i64: 2, 1, 1>, scalar_prefetch = 0 : i64, scratch_operands = 0 : i64, tpu.core_type = #tpu.core_type<tc>, window_params = [{transform_indices = @transform_0, window_bounds = array<i64: 1, 4, 16, 16>}, {pipeline_mode = #tpu.pipeline_mode<synchronous>, transform_indices = @transform_1, window_bounds = array<i64: 16, 32>}, {transform_indices = @transform_2, window_bounds = array<i64: 1, 4, 16, 64>}]} {
    %c0 = arith.constant 0 : index
    %c0_0 = arith.constant 0 : index
    %c0_1 = arith.constant 0 : index
    %c0_2 = arith.constant 0 : index
    %0 = vector.load %arg3[%c0, %c0_0, %c0_1, %c0_2] : memref<1x4x16x16xf32, #tpu.memory_space<vmem>>, vector<1x4x16x16xf32>
    %1 = vector.shape_cast %0 : vector<1x4x16x16xf32> to vector<4x16x16xf32>
    %c0_3 = arith.constant 0 : index
    %c0_4 = arith.constant 0 : index
    %2 = vector.load %arg4[%c0_3, %c0_4] : memref<16x32xf32, #tpu.memory_space<vmem>>, vector<16x32xf32>
    "tpu.trace_start"() <{level = 10 : i32, message = "chw,wk->chk"}> : () -> ()
    %cst = arith.constant dense<0.000000e+00> : vector<4x16x32xf32>
    %3 = tpu.matmul %1, %2, %cst {dimension_numbers = #tpu.dot_dimension_numbers<[2], [0], [0, 1], [1], [0, 0, 0, 1, 1, 1], [], []>} : vector<4x16x16xf32>, vector<16x32xf32>, vector<4x16x32xf32> -> vector<4x16x32xf32>
    "tpu.trace_stop"() : () -> ()
    %c0_5 = arith.constant 0 : index
    %c0_6 = arith.constant 0 : index
    %c0_7 = arith.constant 0 : index
    %c0_8 = arith.constant 0 : index
    %4 = vector.load %arg5[%c0_5, %c0_6, %c0_7, %c0_8] : memref<1x4x16x64xf32, #tpu.memory_space<vmem>>, vector<1x4x16x32xf32>
    %5 = vector.shape_cast %4 : vector<1x4x16x32xf32> to vector<4x16x32xf32>
    %6 = vector.shape_cast %3 : vector<4x16x32xf32> to vector<1x4x16x32xf32>
    tpu.vector_store %arg5[%c0_5, %c0_6, %c0_7, %c0_8], %6 {strides = array<i32>} : memref<1x4x16x64xf32, #tpu.memory_space<vmem>>, vector<1x4x16x32xf32>,
    %c0_9 = arith.constant 0 : index
    %c0_10 = arith.constant 0 : index
    %c0_11 = arith.constant 0 : index
    %c32 = arith.constant 32 : index
    %7 = vector.load %arg5[%c0_9, %c0_10, %c0_11, %c32] : memref<1x4x16x64xf32, #tpu.memory_space<vmem>>, vector<1x4x16x32xf32>
    %8 = vector.shape_cast %7 : vector<1x4x16x32xf32> to vector<4x16x32xf32>
    %9 = vector.shape_cast %3 : vector<4x16x32xf32> to vector<1x4x16x32xf32>
    tpu.vector_store %arg5[%c0_9, %c0_10, %c0_11, %c32], %9 {strides = array<i32>} : memref<1x4x16x64xf32, #tpu.memory_space<vmem>>, vector<1x4x16x32xf32>,
    return
  }
  func.func @transform_0(%arg0: i32, %arg1: i32, %arg2: i32) -> (i32, i32, i32, i32) {
    %c0_i32 = arith.constant 0 : i32
    %c0_i32_0 = arith.constant 0 : i32
    return %arg0, %arg1, %arg2, %c0_i32 : i32, i32, i32, i32
  }
  func.func @transform_1(%arg0: i32, %arg1: i32, %arg2: i32) -> (i32, i32) {
    %c0_i32 = arith.constant 0 : i32
    %c0_i32_0 = arith.constant 0 : i32
    %c0_i32_1 = arith.constant 0 : i32
    return %c0_i32, %c0_i32_0 : i32, i32
  }
  func.func @transform_2(%arg0: i32, %arg1: i32, %arg2: i32) -> (i32, i32, i32, i32) {
    %c0_i32 = arith.constant 0 : i32
    %c0_i32_0 = arith.constant 0 : i32
    return %arg0, %arg1, %arg2, %c0_i32 : i32, i32, i32, i32
  }
}

</mosaic_0001>

<bundles_post_ra>
// kernel: tpu_custom_call.1
= control target key start
LH: loop header
LB: loop body
LE: loop exit
PB: predicated region body
PF: predicated region fallthrough
CT: control target
= control target key end

     0   :  { %7 = vsyncpa [#allocation3], 0  ;;  %s1058_s0 = inlined_call_operand.hbm [shape: f32[2,4,16,16], index: 0, kind: input, shape index: {}]   ;;  %s1059_s1 = inlined_call_operand.hbm [shape: f32[16,32], index: 1, kind: input, shape index: {}]   ;;  %s1060_s2 = inlined_call_operand.hbm [shape: f32[2,4,16,64], index: 2, kind: output, shape index: {}]  }
   0x1   :  { %9 = vsyncpa [#allocation3 + $0x1], 0 }
   0x2   :  { %10 = vsyncpa [#allocation6], 0 }
   0x3   :  { %11 = vsyncpa [#allocation4], 0 }
   0x4   :  { %13 = vsyncpa [#allocation4 + $0x1], 0  ;;  %s824_s9 = smov 0   ;;  %s826_s10 = smov 0  }
   0x5   :  { %s828_s11 = smov 0   ;;  %s830_s12 = smov 0  }
   0x6   :  { %s832_s13 = smov 0   ;;  %s834_s14 = smov 0  }
   0x7 LB: > { %s526_s15 = sadd.s32 4294967295, %s799_s14   ;;  %s527_s16 = sadd.s32 4294967294, %s799_s14   ;;  %s799_s14 = sphi %s834_s14, %s19_s14   ;;  %s795_s13 = sphi %s832_s13, %s1080_s13   ;;  %s791_s12 = sphi %s830_s12, %s1079_s12   ;;  %s787_s11 = sphi %s828_s11, %s1078_s11   ;;  %s783_s10 = sphi %s826_s10, %s1077_s10   ;;  %s779_s9 = sphi %s824_s9, %s1076_s9  }
   0x8   : > { %p62_p0 = scmp.ne.s32.totalorder %s783_s10, %s779_s9  ;;  %p858_p1 = scmp.eq.s32.totalorder %s526_s15, 0 }
   0x9   : > { %p862_p2 = scmp.eq.s32.totalorder %s526_s15, 1  ;;  %p117_p3 = scmp.eq.s32.totalorder %s527_s16, 1 }
   0xa   : > { %p868_p4 = por %p858_p1, %p62_p0  ;;  %p528_p5 = scmp.ge.s32.totalorder %s799_s14, 1 }
   0xb   : > { %p873_p6 = por %p117_p3, %p62_p0  ;;  %p124_p7 = scmp.lt.s32.totalorder %s799_s14, 3 }
   0xc   : > { %s1065_s19 = scalar_select %p868_p4, 1, 0 }
   0xd   : > { %s1066_s20 = scalar_select %p873_p6, 1, 0 }
   0xe   : > { %p878_p8 = pnand %p528_p5, %p124_p7  ;;  %s801_s22 = smov [#allocation5]  }
   0xf   : > { %s136_s23 = sshll.u32 %s801_s22, 4  ;;  %s38_s25 = sadd.s32 1, %s795_s13  ;;  %s137_s23 = int_to_ptr.vmem [resolvable:$true] %s136_s23 }
  0x10   : > { %p591_p9 = pneg %p878_p8  ;;  %s672_s26 = scalar_lea.vmem %s137_s23, 256 }
  0x11   : > { %p673_p13 = scmp.ne.s32.totalorder %s137_s23, %s672_s26  ;;  %p680_p5 = scmp.lt.s32.totalorder %s137_s23, %s137_s23 }
  0x12   : > { %p887_p11 = pnand %p591_p9, %p858_p1  ;;  %p681_p7 = scmp.lt.s32.totalorder %s672_s26, %s672_s26 }
  0x14   : > { %p663_p12 = pneg %p887_p11  ;;  %p682_p6 = por %p681_p7, %p680_p5 }
  0x16   : > { %p675_p0 = pnand %p673_p13, %p663_p12 }
  0x18   : > { %p676_p3 = pneg %p675_p0 }
  0x1a   : > { %p683_p4 = pnand %p682_p6, %p676_p3 }
  0x1c   : > { %686 = shalt.err (!%p683_p4)
}
  0x1d   : > { %s1062_s27 = smov 128   ;;  %s803_s28 = smov 8  }
  0x1e   : > { %594 = dma.hbm_to_vmem [thread:$0]  (!%p887_p11), %s1059_s1, 256, %s137_s23, [#allocation6], %s1062_s27, %s1062_s27, %s803_s28  }
  0x1f   : > { %p40_p4 = scmp.ge.s32.totalorder %s38_s25, 2  ;;  %s49_s3 = sadd.s32 1, %s787_s11 }
  0x20   : > { %p56_p6 = scmp.ne.s32.totalorder %s787_s11, %s783_s10  ;;  %p57_p9 = scmp.eq.s32.totalorder %s799_s14, 0 }
  0x21   : > { %s1082_s25 = smov (%p40_p4, %s38_s25), 0  ;;  %p604_p0 = scmp.lt.s32.totalorder %s799_s14, 2 }
  0x22   : > { %p908_p12 = por %p57_p9, %p56_p6  ;;  %p914_p13 = por %p862_p2, %p56_p6 }
  0x23   : > { %s42_s6 = ssub.s32 %s795_s13, %s1082_s25  ;;  %s150_s7 = sand.u32 1, %s787_s11  }
  0x24   : > { %p47_p11 = scmp.eq.s32.totalorder %s42_s6, 0  ;;  %s531_s8 = sshll.u32 %s150_s7, 6 }
  0x25   : > { %s551_s16 = sshll.u32 %s795_s13, 10  ;;  %s154_s26 = scalar_lea.vmem [#allocation2], %s531_s8 }
  0x26   : > { %s923_s15 = scalar_select %p47_p11, %s787_s11, %s49_s3  }
  0x27   : > { %s165_s24 = scalar_lea.hbm %s1058_s0, %s551_s16  ;;  %s166_s29 = sshll.u32 %s154_s26, 4  ;;  %s167_s29 = int_to_ptr.vmem [resolvable:$true] %s166_s29 }
  0x28   : > { %p931_p2 = pnand %p604_p0, %p908_p12  ;;  %s151_s30 = scalar_lea.sflag [#allocation3], %s150_s7 }
  0x29   : > { %s700_s6 = scalar_lea.vmem %s167_s29, 1024  ;;  %s804_s3 = smov [#allocation2]  }
  0x2a   : > { %p689_p3 = pneg %p931_p2  ;;  %p701_p5 = scmp.ne.s32.totalorder %s167_s29, %s700_s6 }
  0x2b   : > { %s705_s27 = sshll.u32 %s804_s3, 4  ;;  %s706_s27 = int_to_ptr.vmem [resolvable:$false] %s705_s27 }
  0x2c   : > { %p703_p7 = pnand %p701_p5, %p689_p3  ;;  %s707_s16 = scalar_lea.vmem %s706_s27, 2048 }
  0x2d   : > { %p708_p6 = scmp.lt.s32.totalorder %s167_s29, %s706_s27  ;;  %p709_p9 = scmp.lt.s32.totalorder %s707_s16, %s700_s6 }
  0x2e   : > { %p704_p4 = pneg %p703_p7 }
  0x2f   : > { %p710_p11 = por %p709_p9, %p708_p6 }
  0x31   : > { %p711_p10 = pnand %p710_p11, %p704_p4 }
  0x33   : > { %714 = shalt.err (!%p711_p10)
}
  0x34   : > { %s1072_s4 = smov 128   ;;  %178 = sbr.rel (%p878_p8) target bundleno = 400 (0x190), region = 28 }
  0x35   : > { %598 = dma.hbm_to_vmem [thread:$0]  (!%p931_p2), %s165_s24, 1024, %s167_s29, %s151_s30, %s1072_s4, %s1072_s4, %s803_s28  }
  0x36   : > { %s945_s7 = sand.u32 (!%p878_p8), 1, %s783_s10   ;;  %p1073_p10 = scmp.ne.s32.totalorder (!%p878_p8), %s1065_s19, 0 }
  0x37   : > { %s535_s27 = sshll.u32 (!%p878_p8), %s945_s7, 6  ;;  %s181_s8 = scalar_lea.sflag (!%p878_p8), [#allocation3], %s945_s7 }
  0x38   : > { %s184_s22 = scalar_lea.vmem (!%p878_p8), [#allocation2], %s535_s27 }
  0x39   : > { %766 = dma.done.wait (%p1073_p10), %s181_s8, 1024  }
  0x3a   : > { %768 = vsyncadd (%p1073_p10), %s181_s8, 4294966272 }
  0x3b   : > { %770 = dma.done.wait (%p858_p1), [#allocation6], 256  }
  0x3c   : > { %772 = vsyncadd (%p858_p1), [#allocation6], 4294967040  ;;  %v222_v0 = vld [vmem:[#allocation5 + $0x8] sm:$0xff]  ;;  %v221_v1 = vld [vmem:[#allocation5] sm:$0xff]  ;;  %vm223_vm0 = vcmask 130048   ;;  %vm353_vm1 = vcmask 261120  }
  0x3d   : > { %563 = vmatprep.subr.mxu0 %v222_v0  ;;  %579 = vmatprep.subr.mxu1 %v222_v0  ;;  %v213_v2 = vld [vmem:[%s184_s22] sm:$0xff]  ;;  %v214_v4 = vld [vmem:[%s184_s22 + $0x8] sm:$0xff]  ;;  %v215_v6 = vld [vmem:[%s184_s22 + $0x10] sm:$0xff]  ;;  %s969_s17 = scalar_lea.vmem [#allocation7], %s535_s27  ;;  %s805_s19 = smov 32   ;;  %vm394_vm2 = vcmask 523520  }
  0x3e   : > { %564 = vmatpush3.msra.mxu0 %v222_v0  ;;  %581 = vmatpush3.msra.mxu1 %v222_v0  ;;  %v217_v3 = vld [vmem:[%s184_s22 + $0x20] sm:$0xff]  ;;  %v218_v5 = vld [vmem:[%s184_s22 + $0x28] sm:$0xff]  ;;  %v219_v7 = vld [vmem:[%s184_s22 + $0x30] sm:$0xff]  ;;  %s552_s21 = sshll.u32 %s791_s12, 10  ;;  %s422_s28 = sshll.u32 %s969_s17, 4  ;;  %s1006_s28 = int_to_ptr.vmem [resolvable:$true] %s422_s28 }
  0x3f   : > { %565 = vmatprep.subr.mxu0 %v221_v1  ;;  %580 = vmatprep.subr.mxu1 %v221_v1  ;;  %v216_v8 = vld [vmem:[%s184_s22 + $0x18] sm:$0xff]  ;;  %s1004_s26 = scalar_lea.hbm %s1060_s2, %s552_s21  ;;  %s404_s12 = scalar_lea.sflag [#allocation4], %s945_s7 }
  0x40   : > { %566 = vmatpush3.msra.mxu0 %v221_v1  ;;  %582 = vmatpush3.msra.mxu1 %v221_v1  ;;  %v220_v9 = vld [vmem:[%s184_s22 + $0x38] sm:$0xff]  ;;  %s715_s29 = scalar_lea.vmem %s1006_s28, 1024  ;;  %s806_s18 = smov [#allocation7]  }
  0x41   : > { %567 = vmatprep.mubr.msk.f32.mxu0 %vm223_vm0, %v213_v2  ;;  %573 = vmatprep.mubr.msk.f32.mxu1 %vm223_vm0, %v217_v3  ;;  %p716_p1 = scmp.ne.s32.totalorder %s1006_s28, %s715_s29  ;;  %s719_s30 = sshll.u32 %s806_s18, 4  ;;  %s720_s30 = int_to_ptr.vmem [resolvable:$false] %s719_s30 }
  0x42   : > { %568 = vmatmul.mubr.msk.f32.vlgmr.msra.gmra.mxu0 %vm223_vm0, %v214_v4  ;;  %574 = vmatmul.mubr.msk.f32.vlgmr.msra.gmra.mxu1 %vm223_vm0, %v218_v5  ;;  %s721_s6 = scalar_lea.vmem %s720_s30, 2048  ;;  %p722_p0 = scmp.lt.s32.totalorder %s1006_s28, %s720_s30 }
  0x43   : > { %570 = vmatprep.mubr.msk.f32.mxu0 %vm223_vm0, %v215_v6  ;;  %576 = vmatprep.mubr.msk.f32.mxu1 %vm223_vm0, %v219_v7  ;;  %p717_p8 = pnand %p716_p1, %p914_p13  ;;  %p723_p2 = scmp.lt.s32.totalorder %s721_s6, %s715_s29 }
  0x45   : > { %p718_p12 = pneg %p717_p8  ;;  %p724_p3 = por %p723_p2, %p722_p0 }
  0x46   : > { %571 = vmatmul.mubr.msk.f32.gmra.mxu0 %vm223_vm0, %v216_v8  ;;  %577 = vmatmul.mubr.msk.f32.gmra.mxu1 %vm223_vm0, %v220_v9 }
  0x47   : > { %p725_p5 = pnand %p724_p3, %p718_p12 }
 0x102   : > { %v569_v10 = vpop.f32.mrf.mxu0  ;;  %v575_v11 = vpop.f32.mrf.mxu1 }
 0x103   : > { %355 = vst.msk [vmem:[%s969_s17 + $0x8] sm:$0xff] %vm353_vm1, %v569_v10  ;;  %359 = vst.msk [vmem:[%s969_s17 + $0x28] sm:$0xff] %vm353_vm1, %v575_v11  ;;  %380 = vrot.lane.b32.xlu1 %v575_v11, %s805_s19  ;;  %372 = vrot.lane.b32.xlu0 %v569_v10, %s805_s19 }
 0x104   : > { %v314_v12 = vpop.f32.mrf.mxu0  ;;  %v334_v13 = vpop.f32.mrf.mxu1 }
 0x105   : > { %354 = vst.msk [vmem:[%s969_s17] sm:$0xff] %vm353_vm1, %v314_v12  ;;  %358 = vst.msk [vmem:[%s969_s17 + $0x20] sm:$0xff] %vm353_vm1, %v334_v13 }
 0x106   : > { %v572_v14 = vpop.f32.mrf.mxu0  ;;  %v578_v15 = vpop.f32.mrf.mxu1 }
 0x107   : > { %357 = vst.msk [vmem:[%s969_s17 + $0x18] sm:$0xff] %vm353_vm1, %v572_v14  ;;  %370 = vrot.lane.b32.xlu0 %v314_v12, %s805_s19  ;;  %376 = vrot.lane.b32.xlu1 %v572_v14, %s805_s19  ;;  %361 = vst.msk [vmem:[%s969_s17 + $0x38] sm:$0xff] %vm353_vm1, %v578_v15 }
 0x108   : > { %v324_v16 = vpop.f32.mrf.mxu0  ;;  %v344_v17 = vpop.f32.mrf.mxu1 }
 0x109   : > { %356 = vst.msk [vmem:[%s969_s17 + $0x10] sm:$0xff] %vm353_vm1, %v324_v16  ;;  %360 = vst.msk [vmem:[%s969_s17 + $0x30] sm:$0xff] %vm353_vm1, %v344_v17 }
 0x10b   : > { %378 = vrot.lane.b32.xlu0 %v334_v13, %s805_s19  ;;  %374 = vrot.lane.b32.xlu1 %v324_v16, %s805_s19 }
 0x10f   : > { %382 = vrot.lane.b32.xlu0 %v344_v17, %s805_s19  ;;  %384 = vrot.lane.b32.xlu1 %v578_v15, %s805_s19 }
 0x175   : > { %v381_v18 = vpop.permute.xlu1 %380  ;;  %v373_v19 = vpop.permute.xlu0 %372 }
 0x176   : > { %400 = vst.msk [vmem:[%s969_s17 + $0x28] sm:$0xff] %vm394_vm2, %v381_v18  ;;  %396 = vst.msk [vmem:[%s969_s17 + $0x8] sm:$0xff] %vm394_vm2, %v373_v19 }
 0x179   : > { %v371_v20 = vpop.permute.xlu0 %370  ;;  %v377_v21 = vpop.permute.xlu1 %376 }
 0x17a   : > { %395 = vst.msk [vmem:[%s969_s17] sm:$0xff] %vm394_vm2, %v371_v20  ;;  %398 = vst.msk [vmem:[%s969_s17 + $0x18] sm:$0xff] %vm394_vm2, %v377_v21 }
 0x17d   : > { %v379_v22 = vpop.permute.xlu0 %378  ;;  %v375_v23 = vpop.permute.xlu1 %374 }
 0x17e   : > { %399 = vst.msk [vmem:[%s969_s17 + $0x20] sm:$0xff] %vm394_vm2, %v379_v22  ;;  %397 = vst.msk [vmem:[%s969_s17 + $0x10] sm:$0xff] %vm394_vm2, %v375_v23 }
 0x181   : > { %v383_v24 = vpop.permute.xlu0 %382  ;;  %v385_v25 = vpop.permute.xlu1 %384 }
 0x182   : > { %401 = vst.msk [vmem:[%s969_s17 + $0x30] sm:$0xff] %vm394_vm2, %v383_v24  ;;  %402 = vst.msk [vmem:[%s969_s17 + $0x38] sm:$0xff] %vm394_vm2, %v385_v25 }
 0x183   : > { %728 = shalt.err (!%p725_p5)
}
 0x184   : > { %s729_s3 = scalar_lea.hbm %s1004_s26, 1024  ;;  %s733_s27 = scalar_lea.hbm %s1060_s2, 2048 }
 0x185   : > { %p730_p7 = scmp.ne.s32.totalorder %s1004_s26, %s729_s3  ;;  %p734_p9 = scmp.lt.s32.totalorder %s1004_s26, %s1060_s2 }
 0x186   : > { %p735_p11 = scmp.lt.s32.totalorder %s733_s27, %s729_s3 }
 0x187   : > { %p731_p4 = pnand %p730_p7, %p914_p13 }
 0x188   : > { %p736_p10 = por %p735_p11, %p734_p9 }
 0x189   : > { %p732_p6 = pneg %p731_p4 }
 0x18b   : > { %p737_p1 = pnand %p736_p10, %p732_p6 }
 0x18d   : > { %740 = shalt.err (!%p737_p1)
}
 0x18e   : > { %s807_s17 = smov 128   ;;  %s808_s19 = smov 8  }
 0x18f   : > { %589 = dma.vmem_to_hbm [thread:$0]  (%p914_p13), %s1006_s28, 1024, %s1004_s26, %s404_s12, %s807_s17, %s807_s17, %s808_s19  }
 0x190 PF: > { %s437_s21 = sand.u32 1, %s779_s9   ;;  %p1074_p8 = scmp.ne.s32.totalorder %s1066_s20, 0 }
 0x191   : > { %p1075_p12 = scmp.ge.s32.totalorder %s799_s14, 2  ;;  %s438_s23 = scalar_lea.sflag [#allocation4], %s437_s21 }
 0x193   : > { %p600_p0 = pnand %p1075_p12, %p1074_p8 }
 0x195   : > { %p601_p2 = pneg %p600_p0 }
 0x197   : > { %774 = dma.done.wait (%p601_p2), %s438_s23, 1024  }
 0x198   : > { %776 = vsyncadd (%p601_p2), %s438_s23, 4294966272  ;;  %s19_s14 = sadd.s32 1, %s799_s14   ;;  %s1076_s9 = smov %s783_s10 }
 0x199   : > { %p16_p3 = scmp.ge.s32.totalorder %s19_s14, 4   ;;  %s1077_s10 = smov %s787_s11 }
 0x19a   : > { %s1078_s11 = smov %s923_s15  ;;  %s1079_s12 = smov %s795_s13 }
 0x19b   : > { %s1080_s13 = smov %s1082_s25  ;;  %18 = sbr.rel (!%p16_p3) target bundleno = 7 (0x7), region = 77 }
 0x1a0   :  { %443 = vsyncpa [#allocation3], 1 }
 0x1a1   :  { %445 = vsyncpa [#allocation3 + $0x1], 1 }
 0x1a2   :  { %446 = vsyncpa [#allocation6], 1 }
 0x1a3   :  { %447 = vsyncpa [#allocation4], 1 }
 0x1a4   :  { %449 = vsyncpa [#allocation4 + $0x1], 1 }

</bundles_post_ra>
